<compile_context>
chip_gen: v7x
topology: tpu7x:2x2x1
jax: 0.10.0
libtpu: 0.0.40
codegen_flags: <defaults>
</compile_context>

<pallas_src>
import math

import jax
import jax.numpy as jnp
import numpy as np
from jax import lax
from jax.experimental import pallas as pl
from jax.experimental.pallas import tpu as pltpu

# ---- static config (small shapes consistent with the module) ----
BATCH          = 2
SEQ_LEN        = 16
VOCAB          = 50
EMB            = 32                      # embedding_size / input_size
OUT_CH         = 8                       # args.feature_maps
FILTER_HEIGHTS = (2, 4)                  # args.filter_sizes
NF             = len(FILTER_HEIGHTS)
FH_MAX         = max(FILTER_HEIGHTS)     # 4
PAD            = FH_MAX - 1              # unified padding = 3
L_MAX          = SEQ_LEN + FH_MAX - 1    # 19: unified conv output length
POOL           = 4                       # args.dynamic_pool
INTER          = 32                      # args.intermidiate
N_CLASS        = 16                      # number_of_class
LINEAR_SIZE    = OUT_CH * NF * POOL      # 64
C_TOT          = NF * OUT_CH             # 16 stacked conv output channels
KDIM           = FH_MAX * EMB            # 128: fused conv contraction dim
LANES          = 128                     # lane-dense padding of BATCH*L_MAX = 38
OUT_LANES      = 128                     # lane-dense padding of N_CLASS


def _bin_bounds(j, length, pool):
    # PyTorch AdaptiveMaxPool1d bin boundaries: [floor(j*L/p), ceil((j+1)*L/p))
    s = (j * length) // pool
    e = math.ceil((j + 1) * length / pool)
    return s, e


# --------------------------------------------------------------------------
# Pallas kernel: whole forward pass in one invocation (no grid).
# --------------------------------------------------------------------------
def xmlcnn_kernel(xut_ref, wc_ref, bc_ref, pm_ref, wi_ref, bi_ref, wl_ref, bl_ref,
                  out_ref):
    # Fused conv over both filters and the whole batch:
    # one bf16 (16,128)@(128,128) MXU matmul with f32 accumulation.
    conv = jnp.dot(wc_ref[...], xut_ref[...],
                   preferred_element_type=jnp.float32)            # (C_TOT, LANES)
    conv = jnp.maximum(conv + bc_ref[...], 0.0)                   # bias + ReLU

    # Adaptive max pooling: one masked reduce over the lane axis.  Valid because
    # conv >= 0 post-ReLU and padded / out-of-bin / other-batch lanes have mask=0.
    pooled = jnp.max(pm_ref[...] * conv, axis=2)                  # (POOL*BATCH, C_TOT)

    # Intermediate Linear: four independent (B, C_TOT)@(C_TOT, I) dots, one per
    # pool bin (weights pre-permuted so wi_ref[p] multiplies bin p), then summed.
    hidden = bi_ref[...]                                          # (1, INTER)
    for p in range(POOL):
        seg = pooled[p * BATCH:(p + 1) * BATCH, :]                # (BATCH, C_TOT)
        hidden = hidden + jnp.dot(seg, wi_ref[p],
                                  preferred_element_type=jnp.float32)
    lin1 = jnp.maximum(hidden, 0.0)                               # (BATCH, INTER)

    # Final Linear with lane-dense (zero-padded) output columns.
    out = jnp.dot(lin1, wl_ref[...],
                  preferred_element_type=jnp.float32) + bl_ref[...]   # (BATCH, 128)
    out_ref[...] = out.astype(out_ref.dtype)                      # one full-block store


# --------------------------------------------------------------------------
# One-time parameter packing (kept OUT of the per-call jitted path).
# --------------------------------------------------------------------------
def prepare_params(params):
    # Stack conv weights along output channels; a filter of height fh reads the
    # LAST fh taps of the unified FH_MAX-tap unfold, so pad its K on the left.
    wc_rows, bc_rows = [], []
    for w, b, fh in zip(params["conv_w"], params["conv_b"], FILTER_HEIGHTS):
        w_flat = w.reshape(OUT_CH, fh * EMB)                              # (C, fh*E), K order (tap, e)
        left = jnp.zeros((OUT_CH, (FH_MAX - fh) * EMB), jnp.float32)
        wc_rows.append(jnp.concatenate([left, w_flat], axis=1))           # (C, KDIM)
        bc_rows.append(b.reshape(OUT_CH, 1))
    wc = jnp.concatenate(wc_rows, axis=0).astype(jnp.bfloat16)            # (C_TOT, KDIM) bf16
    bc = jnp.concatenate(bc_rows, axis=0)                                 # (C_TOT, 1)

    # Pool-bin membership mask: rows (p, b), cols (filter, channel), lanes (b, t),
    # block-diagonal over batch, zero on lane padding and on the fh=2 filter's
    # extra (invalid) positions.
    pm = np.zeros((POOL * BATCH, C_TOT, LANES), np.float32)
    for f, fh in enumerate(FILTER_HEIGHTS):
        Lf = SEQ_LEN + fh - 1
        for p in range(POOL):
            s, e = _bin_bounds(p, Lf, POOL)
            for b in range(BATCH):
                pm[p * BATCH + b, f * OUT_CH:(f + 1) * OUT_CH,
                   b * L_MAX + s:b * L_MAX + e] = 1.0
    pm = jnp.asarray(pm)

    # wi permuted so wi_r[p, f*C + c, i] multiplies pooled feature (b, f, c, p)
    # (PyTorch flatten order of the pooled features is (filter, channel, bin)).
    wi_r = (params["wi"].reshape(INTER, NF, OUT_CH, POOL)
            .transpose(3, 1, 2, 0).reshape(POOL, C_TOT, INTER))           # (POOL, C_TOT, I)
    bi = params["bi"].reshape(1, INTER)
    wl = jnp.pad(params["wl"].T, ((0, 0), (0, OUT_LANES - N_CLASS)))      # (I, 128) lane-dense
    bl = jnp.pad(params["bl"].reshape(1, N_CLASS),
                 ((0, 0), (0, OUT_LANES - N_CLASS)))                      # (1, 128)

    return {"embedding": params["embedding"], "wc": wc, "bc": bc, "pm": pm,
            "wi": wi_r, "bi": bi, "wl": wl, "bl": bl}


# --------------------------------------------------------------------------
# Per-call wrapper (jitted): embedding gather + unified unfold + pallas_call.
# --------------------------------------------------------------------------
def xmlcnn_forward_impl(tokens, prep):
    """tokens: (S, B) int32 (PyTorch `input[0]` convention); returns (B, N_CLASS) f32."""
    x = jnp.take(prep["embedding"], tokens, axis=0)            # (S, B, E)  embedding lookup
    x = jnp.transpose(x, (1, 0, 2))                            # (B, S, E)  .transpose(0, 1)
    xp = jnp.pad(x, ((0, 0), (PAD, PAD), (0, 0)))              # unified Conv2d padding

    # Unified 4-tap unfold directly in (K, lanes) layout: K = (tap, e), lane = (b, t).
    taps = jnp.stack([xp[:, k:k + L_MAX, :] for k in range(FH_MAX)], axis=0)   # (4, B, L_MAX, E)
    slab = jnp.transpose(taps, (0, 3, 1, 2)).reshape(KDIM, BATCH * L_MAX)      # (128, 38)
    xut = jnp.pad(slab, ((0, 0), (0, LANES - BATCH * L_MAX))).astype(jnp.bfloat16)  # (128, 128)

    inputs = (xut, prep["wc"], prep["bc"], prep["pm"],
              prep["wi"], prep["bi"], prep["wl"], prep["bl"])
    out = pl.pallas_call(
        xmlcnn_kernel,
        out_shape=jax.ShapeDtypeStruct((BATCH, OUT_LANES), jnp.float32),
        in_specs=[pl.BlockSpec(memory_space=pltpu.MemorySpace.VMEM)] * len(inputs),
        out_specs=pl.BlockSpec(memory_space=pltpu.MemorySpace.VMEM),
    )(*inputs)
    return out[:, :N_CLASS]


xmlcnn_forward = jax.jit(xmlcnn_forward_impl)


# --------------------------------------------------------------------------
# Pure-JAX reference mirroring the PyTorch forward (NCHW conv, f32 throughout).
# --------------------------------------------------------------------------
def xmlcnn_forward_ref(tokens, params):
    x = jnp.take(params["embedding"], tokens, axis=0).transpose(1, 0, 2)   # (B, S, E)
    x4 = x[:, None, :, :]                                                  # (B, 1, S, E) NCHW
    feats = []
    for w, b, fh in zip(params["conv_w"], params["conv_b"], FILTER_HEIGHTS):
        w4 = w[:, None, :, :]                                              # (C, 1, fh, E) OIHW
        conv = lax.conv_general_dilated(
            x4, w4, window_strides=(1, 1),
            padding=((fh - 1, fh - 1), (0, 0)),
            dimension_numbers=("NCHW", "OIHW", "NCHW"))                    # (B, C, L, 1)
        conv = jax.nn.relu(conv + b[None, :, None, None])[..., 0]          # (B, C, L)
        L = SEQ_LEN + fh - 1
        pooled = jnp.stack(
            [jnp.max(conv[:, :, _bin_bounds(j, L, POOL)[0]:_bin_bounds(j, L, POOL)[1]], axis=2)
             for j in range(POOL)], axis=-1)                               # (B, C, p)
        feats.append(pooled)
    xcat = jnp.concatenate(feats, axis=1).reshape(BATCH, LINEAR_SIZE)
    lin1 = jax.nn.relu(xcat @ params["wi"].T + params["bi"])
    return lin1 @ params["wl"].T + params["bl"]


def init_params(key):
    ks = jax.random.split(key, 4 + 2 * NF)
    lim = math.sqrt(3.0 / EMB)
    params = {
        "embedding": jax.random.uniform(ks[0], (VOCAB, EMB), jnp.float32, -lim, lim),
        "conv_w": [], "conv_b": [],
        "wi": jax.random.normal(ks[1], (INTER, LINEAR_SIZE), jnp.float32) * 0.1,
        "bi": jax.random.normal(ks[2], (INTER,), jnp.float32) * 0.1,
        "wl": jax.random.normal(ks[3], (N_CLASS, INTER), jnp.float32) * 0.1,
        "bl": jnp.zeros((N_CLASS,), jnp.float32),
    }
    for i, fh in enumerate(FILTER_HEIGHTS):
        kw, kb = ks[4 + 2 * i], ks[5 + 2 * i]
        params["conv_w"].append(jax.random.normal(kw, (OUT_CH, fh, EMB), jnp.float32) * 0.1)
        params["conv_b"].append(jax.random.normal(kb, (OUT_CH,), jnp.float32) * 0.1)
    return params


if __name__ == "__main__":
    key = jax.random.PRNGKey(0)
    kp, kt = jax.random.split(key)
    params = init_params(kp)
    prep = prepare_params(params)          # one-time weight packing, outside the hot path
    tokens = jax.random.randint(kt, (SEQ_LEN, BATCH), 0, VOCAB, dtype=jnp.int32)

    out = jax.block_until_ready(xmlcnn_forward(tokens, prep))
    ref = jax.block_until_ready(xmlcnn_forward_ref(tokens, params))

    assert out.shape == (BATCH, N_CLASS), out.shape
    # Conv operands run in bf16 on the MXU (f32 accumulation), so tolerance is
    # relaxed vs. the all-f32 reference.
    np.testing.assert_allclose(np.asarray(out), np.asarray(ref), rtol=5e-2, atol=2e-2)
    print("KERNEL_OK")
</pallas_src>

<mosaic_0001>
module attributes {stable_mosaic.version = 11 : i64} {
  func.func @xmlcnn_kernel(%arg0: memref<128x128xbf16, #tpu.memory_space<vmem>>, %arg1: memref<16x128xbf16, #tpu.memory_space<vmem>>, %arg2: memref<16x1xf32, #tpu.memory_space<vmem>>, %arg3: memref<8x16x128xf32, #tpu.memory_space<vmem>>, %arg4: memref<4x16x32xf32, #tpu.memory_space<vmem>>, %arg5: memref<1x32xf32, #tpu.memory_space<vmem>>, %arg6: memref<32x128xf32, #tpu.memory_space<vmem>>, %arg7: memref<1x128xf32, #tpu.memory_space<vmem>>, %arg8: memref<2x128xf32, #tpu.memory_space<vmem>>) attributes {dimension_semantics = [], scalar_prefetch = 0 : i64, scratch_operands = 0 : i64, tpu.core_type = #tpu.core_type<tc>} {
    %c0 = arith.constant 0 : index
    %c0_0 = arith.constant 0 : index
    %0 = vector.load %arg1[%c0, %c0_0] : memref<16x128xbf16, #tpu.memory_space<vmem>>, vector<16x128xbf16>
    %c0_1 = arith.constant 0 : index
    %c0_2 = arith.constant 0 : index
    %1 = vector.load %arg0[%c0_1, %c0_2] : memref<128x128xbf16, #tpu.memory_space<vmem>>, vector<128x128xbf16>
    %cst = arith.constant dense<0.000000e+00> : vector<16x128xf32>
    %2 = tpu.matmul %0, %1, %cst {dimension_numbers = #tpu.dot_dimension_numbers<[1], [0], [0], [1], [0, 0, 1, 1], [], []>} : vector<16x128xbf16>, vector<128x128xbf16>, vector<16x128xf32> -> vector<16x128xf32>
    %c0_3 = arith.constant 0 : index
    %c0_4 = arith.constant 0 : index
    %3 = vector.load %arg2[%c0_3, %c0_4] : memref<16x1xf32, #tpu.memory_space<vmem>>, vector<16x1xf32>
    %4 = vector.broadcast %3 : vector<16x1xf32> to vector<16x128xf32>
    %5 = arith.addf %2, %4 : vector<16x128xf32>
    %cst_5 = arith.constant 0.000000e+00 : f32
    %6 = vector.broadcast %cst_5 : f32 to vector<16x128xf32>
    %7 = arith.maximumf %5, %6 : vector<16x128xf32>
    %c0_6 = arith.constant 0 : index
    %c0_7 = arith.constant 0 : index
    %c0_8 = arith.constant 0 : index
    %8 = vector.load %arg3[%c0_6, %c0_7, %c0_8] : memref<8x16x128xf32, #tpu.memory_space<vmem>>, vector<8x16x128xf32>
    %9 = vector.shape_cast %7 : vector<16x128xf32> to vector<1x16x128xf32>
    %10 = vector.broadcast %9 : vector<1x16x128xf32> to vector<8x16x128xf32>
    %11 = arith.mulf %8, %10 : vector<8x16x128xf32>
    %cst_9 = arith.constant dense<0xFF800000> : vector<8x16xf32>
    %12 = vector.multi_reduction <maximumf>, %11, %cst_9 [2] : vector<8x16x128xf32> to vector<8x16xf32>
    %c0_10 = arith.constant 0 : index
    %c0_11 = arith.constant 0 : index
    %13 = vector.load %arg5[%c0_10, %c0_11] : memref<1x32xf32, #tpu.memory_space<vmem>>, vector<1x32xf32>
    %14 = vector.extract_strided_slice %12 {offsets = [0, 0], sizes = [2, 16], strides = [1, 1]} : vector<8x16xf32> to vector<2x16xf32>
    %c0_12 = arith.constant 0 : index
    %c0_13 = arith.constant 0 : index
    %c0_14 = arith.constant 0 : index
    %15 = vector.load %arg4[%c0_12, %c0_13, %c0_14] : memref<4x16x32xf32, #tpu.memory_space<vmem>>, vector<1x16x32xf32>
    %16 = vector.shape_cast %15 : vector<1x16x32xf32> to vector<16x32xf32>
    %cst_15 = arith.constant dense<0.000000e+00> : vector<2x32xf32>
    %17 = tpu.matmul %14, %16, %cst_15 {dimension_numbers = #tpu.dot_dimension_numbers<[1], [0], [0], [1], [0, 0, 1, 1], [], []>} : vector<2x16xf32>, vector<16x32xf32>, vector<2x32xf32> -> vector<2x32xf32>
    %18 = vector.broadcast %13 : vector<1x32xf32> to vector<2x32xf32>
    %19 = arith.addf %18, %17 : vector<2x32xf32>
    %20 = vector.extract_strided_slice %12 {offsets = [2, 0], sizes = [2, 16], strides = [1, 1]} : vector<8x16xf32> to vector<2x16xf32>
    %c1 = arith.constant 1 : index
    %c0_16 = arith.constant 0 : index
    %c0_17 = arith.constant 0 : index
    %21 = vector.load %arg4[%c1, %c0_16, %c0_17] : memref<4x16x32xf32, #tpu.memory_space<vmem>>, vector<1x16x32xf32>
    %22 = vector.shape_cast %21 : vector<1x16x32xf32> to vector<16x32xf32>
    %cst_18 = arith.constant dense<0.000000e+00> : vector<2x32xf32>
    %23 = tpu.matmul %20, %22, %cst_18 {dimension_numbers = #tpu.dot_dimension_numbers<[1], [0], [0], [1], [0, 0, 1, 1], [], []>} : vector<2x16xf32>, vector<16x32xf32>, vector<2x32xf32> -> vector<2x32xf32>
    %24 = arith.addf %19, %23 : vector<2x32xf32>
    %25 = vector.extract_strided_slice %12 {offsets = [4, 0], sizes = [2, 16], strides = [1, 1]} : vector<8x16xf32> to vector<2x16xf32>
    %c2 = arith.constant 2 : index
    %c0_19 = arith.constant 0 : index
    %c0_20 = arith.constant 0 : index
    %26 = vector.load %arg4[%c2, %c0_19, %c0_20] : memref<4x16x32xf32, #tpu.memory_space<vmem>>, vector<1x16x32xf32>
    %27 = vector.shape_cast %26 : vector<1x16x32xf32> to vector<16x32xf32>
    %cst_21 = arith.constant dense<0.000000e+00> : vector<2x32xf32>
    %28 = tpu.matmul %25, %27, %cst_21 {dimension_numbers = #tpu.dot_dimension_numbers<[1], [0], [0], [1], [0, 0, 1, 1], [], []>} : vector<2x16xf32>, vector<16x32xf32>, vector<2x32xf32> -> vector<2x32xf32>
    %29 = arith.addf %24, %28 : vector<2x32xf32>
    %30 = vector.extract_strided_slice %12 {offsets = [6, 0], sizes = [2, 16], strides = [1, 1]} : vector<8x16xf32> to vector<2x16xf32>
    %c3 = arith.constant 3 : index
    %c0_22 = arith.constant 0 : index
    %c0_23 = arith.constant 0 : index
    %31 = vector.load %arg4[%c3, %c0_22, %c0_23] : memref<4x16x32xf32, #tpu.memory_space<vmem>>, vector<1x16x32xf32>
    %32 = vector.shape_cast %31 : vector<1x16x32xf32> to vector<16x32xf32>
    %cst_24 = arith.constant dense<0.000000e+00> : vector<2x32xf32>
    %33 = tpu.matmul %30, %32, %cst_24 {dimension_numbers = #tpu.dot_dimension_numbers<[1], [0], [0], [1], [0, 0, 1, 1], [], []>} : vector<2x16xf32>, vector<16x32xf32>, vector<2x32xf32> -> vector<2x32xf32>
    %34 = arith.addf %29, %33 : vector<2x32xf32>
    %cst_25 = arith.constant 0.000000e+00 : f32
    %35 = vector.broadcast %cst_25 : f32 to vector<2x32xf32>
    %36 = arith.maximumf %34, %35 : vector<2x32xf32>
    %c0_26 = arith.constant 0 : index
    %c0_27 = arith.constant 0 : index
    %37 = vector.load %arg6[%c0_26, %c0_27] : memref<32x128xf32, #tpu.memory_space<vmem>>, vector<32x128xf32>
    %cst_28 = arith.constant dense<0.000000e+00> : vector<2x128xf32>
    %38 = tpu.matmul %36, %37, %cst_28 {dimension_numbers = #tpu.dot_dimension_numbers<[1], [0], [0], [1], [0, 0, 1, 1], [], []>} : vector<2x32xf32>, vector<32x128xf32>, vector<2x128xf32> -> vector<2x128xf32>
    %c0_29 = arith.constant 0 : index
    %c0_30 = arith.constant 0 : index
    %39 = vector.load %arg7[%c0_29, %c0_30] : memref<1x128xf32, #tpu.memory_space<vmem>>, vector<1x128xf32>
    %40 = vector.broadcast %39 : vector<1x128xf32> to vector<2x128xf32>
    %41 = arith.addf %38, %40 : vector<2x128xf32>
    %c0_31 = arith.constant 0 : index
    %c0_32 = arith.constant 0 : index
    %42 = vector.load %arg8[%c0_31, %c0_32] : memref<2x128xf32, #tpu.memory_space<vmem>>, vector<2x128xf32>
    tpu.vector_store %arg8[%c0_31, %c0_32], %41 {strides = array<i32>} : memref<2x128xf32, #tpu.memory_space<vmem>>, vector<2x128xf32>,
    return
  }
}

</mosaic_0001>

<bundles_post_ra>
// kernel: xmlcnn_forward_impl.1
= control target key start
LH: loop header
LB: loop body
LE: loop exit
PB: predicated region body
PF: predicated region fallthrough
CT: control target
= control target key end

     0   :  { %v902_v1 = vmov 0.0   ;;  %vm903_vm0 = vmmov 0   ;;  %v904_v3 = vmov 0   ;;  %s1149_s0 = inlined_call_operand.vmem [shape: bf16[128,128], index: 0, kind: input, shape index: {}]   ;;  %s1150_s1 = inlined_call_operand.vmem [shape: bf16[16,128], index: 1, kind: input, shape index: {}]   ;;  %s1151_s2 = inlined_call_operand.vmem [shape: f32[16,1], index: 2, kind: input, shape index: {}]   ;;  %s1152_s3 = inlined_call_operand.vmem [shape: f32[8,16,128], index: 3, kind: input, shape index: {}]   ;;  %s1153_s4 = inlined_call_operand.vmem [shape: f32[4,16,32], index: 4, kind: input, shape index: {}]   ;;  %s1154_s5 = inlined_call_operand.vmem [shape: f32[1,32], index: 5, kind: input, shape index: {}]   ;;  %s1155_s6 = inlined_call_operand.vmem [shape: f32[32,128], index: 6, kind: input, shape index: {}]   ;;  %s1156_s7 = inlined_call_operand.vmem [shape: f32[1,128], index: 7, kind: input, shape index: {}]   ;;  %s1157_s8 = inlined_call_operand.hbm [shape: f32[2,128], index: 8, kind: output, shape index: {}]  }
   0x1   :  { %v869_v0 = vld [vmem:[%s1149_s0] sm:$0xff]   ;;  %779 = vmatprep.subr.bf16.mxu0 %v902_v1  ;;  %v870_v2 = vld [vmem:[%s1149_s0 + $0x8] sm:$0xff]   ;;  %795 = vmatprep.mubr.msk.bf16.mxu0 %vm903_vm0, %v902_v1  ;;  %v871_v4 = vld [vmem:[%s1149_s0 + $0x10] sm:$0xff]  }
   0x2   :  { %780 = vmatpush3.bf16.msra.mxu0 %v869_v0  ;;  %868 = vset.pattern.permute.xlu0 %v904_v3  ;;  %v49_v5 = vld [vmem:[%s1151_s2] sm:$0xff] }
   0x3   :  { %781 = vmatprep.subr.bf16.mxu0 %v902_v1  ;;  %803 = vmatprep.mubr.msk.f32.mxu1 %vm903_vm0, %v902_v1 }
   0x6   :  { %782 = vmatpush3.bf16.msra.mxu0 %v870_v2 }
   0x7   :  { %783 = vmatprep.subr.bf16.mxu0 %v902_v1 }
   0x8   :  { %13 = vsyncpa [#allocation3], 0  ;;  %v872_v6 = vld [vmem:[%s1149_s0 + $0x18] sm:$0xff]   ;;  %53 = vperm.xlu0 %868, %v49_v5   ;;  %v50_v7 = vld [vmem:[%s1151_s2 + $0x8] sm:$0xff]  ;;  %v905_v50 = vmov 0.0|0.0   ;;  %v229_v61 = vlaneseq  ;;  %vm240_vm1 = vcmask 130112  }
   0x9   :  { %v873_v8 = vld [vmem:[%s1149_s0 + $0x20] sm:$0xff]   ;;  %v874_v9 = vld [vmem:[%s1149_s0 + $0x28] sm:$0xff]   ;;  %v875_v10 = vld [vmem:[%s1149_s0 + $0x30] sm:$0xff]   ;;  %838 = vmatprep.subr.bf16.mxu1 %v905_v50  ;;  %vm251_vm2 = vcmask 1041409   ;;  %vm253_vm3 = vcmask 130048   ;;  %vm642_vm4 = vcmask 261120  }
   0xa   :  { %784 = vmatpush3.bf16.msra.mxu0 %v871_v4  ;;  %v876_v11 = vld [vmem:[%s1149_s0 + $0x38] sm:$0xff]   ;;  %v877_v12 = vld [vmem:[%s1150_s1] sm:$0xff]   ;;  %v160_v19 = vld [vmem:[%s1152_s3 + $0x10] sm:$0xff]  ;;  %v230_v63 = vand.u32 127, %v229_v61  ;;  %v232_v2 = vshrl.u32 %v229_v61, 7  ;;  %s906_s10 = smov [#allocation2]  }
   0xb   :  { %785 = vmatprep.subr.bf16.mxu0 %v902_v1  ;;  %v158_v20 = vld [vmem:[%s1152_s3] sm:$0xff]  ;;  %v169_v28 = vld [vmem:[%s1152_s3 + $0x58] sm:$0xff]  ;;  %v164_v31 = vld [vmem:[%s1152_s3 + $0x30] sm:$0xff]  ;;  %s723_s11 = sshll.u32 %s906_s10, 4  ;;  %s724_s11 = int_to_ptr.vmem [resolvable:$true] %s723_s11 }
   0xc   :  { %58 = vperm.xlu0 %868, %v50_v7   ;;  %v162_v27 = vld [vmem:[%s1152_s3 + $0x20] sm:$0xff]  ;;  %v171_v32 = vld [vmem:[%s1152_s3 + $0x68] sm:$0xff]  ;;  %v173_v36 = vld [vmem:[%s1152_s3 + $0x78] sm:$0xff]  ;;  %v235_v3 = vadd.s32 4294967288, %v230_v63  ;;  %v1053_v5 = vsub.s32 %v230_v63, %v232_v2  ;;  %p883_p1 = scmp.lt.s32.totalorder %s724_s11, %s724_s11 }
   0xd   :  { %v166_v35 = vld [vmem:[%s1152_s3 + $0x40] sm:$0xff]  ;;  %v159_v39 = vld [vmem:[%s1152_s3 + $0x8] sm:$0xff]  ;;  %v161_v41 = vld [vmem:[%s1152_s3 + $0x18] sm:$0xff] }
   0xe   :  { %786 = vmatpush3.bf16.msra.mxu0 %v872_v6  ;;  %v163_v43 = vld [vmem:[%s1152_s3 + $0x28] sm:$0xff]  ;;  %v165_v45 = vld [vmem:[%s1152_s3 + $0x38] sm:$0xff]  ;;  %v168_v47 = vld [vmem:[%s1152_s3 + $0x50] sm:$0xff]  ;;  %v1055_v6 = vsub.s32 %v235_v3, %v232_v2 }
   0xf   :  { %787 = vmatprep.subr.bf16.mxu0 %v902_v1  ;;  %v167_v49 = vld [vmem:[%s1152_s3 + $0x48] sm:$0xff]  ;;  %v170_v52 = vld [vmem:[%s1152_s3 + $0x60] sm:$0xff]  ;;  %v172_v57 = vld [vmem:[%s1152_s3 + $0x70] sm:$0xff] }
  0x10   :  { %v223_v53 = vld [vmem:[%s1153_s4] sm:$0xff]  ;;  %v224_v54 = vld [vmem:[%s1153_s4 + $0x8] sm:$0xff] }
  0x11   :  { %v839_v55 = vpack.c.bf16 %v224_v54, %v223_v53 }
  0x12   :  { %788 = vmatpush3.bf16.msra.mxu0 %v873_v8 }
  0x13   :  { %789 = vmatprep.subr.bf16.mxu0 %v902_v1  ;;  %840 = vmatpush3.bf16.msra.mxu1 %v839_v55 }
  0x14   :  { %841 = vmatprep.subr.bf16.mxu1 %v905_v50 }
  0x16   :  { %790 = vmatpush3.bf16.msra.mxu0 %v874_v9  ;;  %v742_v9 = vld [vmem:[%s1153_s4 + $0x10] sm:$0xff] }
  0x17   :  { %791 = vmatprep.subr.bf16.mxu0 %v902_v1 }
  0x1a   :  { %792 = vmatpush3.bf16.msra.mxu0 %v875_v10  ;;  %v743_v10 = vld [vmem:[%s1153_s4 + $0x18] sm:$0xff] }
  0x1b   :  { %793 = vmatprep.subr.bf16.mxu0 %v902_v1 }
  0x1e   :  { %794 = vmatpush3.bf16.msra.mxu0 %v876_v11 }
  0x21   :  { %796 = vmatmul.mubr.bf16.vlgmr.msra.gmra.mrb[0].mxu0 %v877_v12 }
  0x87   :  { %v54_v13 = vpop.permute.xlu0 %53 }
  0x8b   :  { %v59_v17 = vpop.permute.xlu0 %58 }
  0xf4   :  { %v149_v14 = vpop.f32.mrb[0].mxu0 }
  0xf5   :  { %v150_v15 = vadd.f32 %v149_v14, %v54_v13  ;;  %v797_v16 = vpop.f32.mrb[1].mxu0 }
  0xf6   :  { %v152_v18 = vpop.f32.mrb[2].mxu0 }
  0xf7   :  { %v156_v21 = vmax.f32 %v150_v15, 0.0  ;;  %v153_v22 = vadd.f32 %v152_v18, %v59_v17  ;;  %v798_v23 = vpop.f32.mrb[3].mxu0  ;;  %v842_v15 = vpack.c.bf16 %v743_v10, %v742_v9 }
  0xf9   :  { %v157_v24 = vmax.f32 %v153_v22, 0.0  ;;  %v176_v25 = vmul.f32 %v160_v19, %v156_v21  ;;  %v174_v26 = vmul.f32 %v158_v20, %v156_v21  ;;  %v178_v29 = vmul.f32 %v162_v27, %v156_v21  ;;  %v746_v22 = vld [vmem:[%s1153_s4 + $0x28] sm:$0xff] }
  0xfa   :  { %v180_v33 = vmul.f32 %v164_v31, %v156_v21  ;;  %v182_v37 = vmul.f32 %v166_v35, %v156_v21  ;;  %v184_v48 = vmul.f32 %v168_v47, %v156_v21  ;;  %v186_v56 = vmul.f32 %v170_v52, %v156_v21  ;;  %v749_v35 = vld [vmem:[%s1153_s4 + $0x38] sm:$0xff] }
  0xfb   :  { %194 = vmax.xlane.f32.xlu0 %v176_v25  ;;  %190 = vmax.xlane.f32.xlu1 %v174_v26  ;;  %v185_v30 = vmul.f32 %v169_v28, %v157_v24  ;;  %v187_v34 = vmul.f32 %v171_v32, %v157_v24  ;;  %v189_v38 = vmul.f32 %v173_v36, %v157_v24 }
  0xfc   :  { %v175_v40 = vmul.f32 %v159_v39, %v157_v24  ;;  %v177_v42 = vmul.f32 %v161_v41, %v157_v24  ;;  %v179_v44 = vmul.f32 %v163_v43, %v157_v24  ;;  %v181_v46 = vmul.f32 %v165_v45, %v157_v24 }
  0xfd   :  { %v183_v51 = vmul.f32 %v167_v49, %v157_v24  ;;  %v188_v58 = vmul.f32 %v172_v57, %v156_v21  ;;  %v745_v21 = vld [vmem:[%s1153_s4 + $0x20] sm:$0xff]  ;;  %v632_v49 = vld [vmem:[%s1155_s6 + $0x8] sm:$0xff] }
  0xfe   :  { %v845_v28 = vpack.c.bf16 %v746_v22, %v745_v21 }
  0xff   :  { %198 = vmax.xlane.f32.xlu1 %v178_v29  ;;  %212 = vmax.xlane.f32.xlu0 %v185_v30 }
 0x103   :  { %202 = vmax.xlane.f32.xlu1 %v180_v33  ;;  %216 = vmax.xlane.f32.xlu0 %v187_v34  ;;  %v748_v34 = vld [vmem:[%s1153_s4 + $0x30] sm:$0xff] }
 0x104   :  { %v848_v41 = vpack.c.bf16 %v749_v35, %v748_v34 }
 0x107   :  { %206 = vmax.xlane.f32.xlu1 %v182_v37  ;;  %220 = vmax.xlane.f32.xlu0 %v189_v38 }
 0x10b   :  { %192 = vmax.xlane.f32.xlu1 %v175_v40 }
 0x10f   :  { %196 = vmax.xlane.f32.xlu1 %v177_v42 }
 0x113   :  { %200 = vmax.xlane.f32.xlu1 %v179_v44 }
 0x117   :  { %204 = vmax.xlane.f32.xlu1 %v181_v46 }
 0x11b   :  { %210 = vmax.xlane.f32.xlu1 %v184_v48  ;;  %v631_v48 = vld [vmem:[%s1155_s6] sm:$0xff] }
 0x11c   :  { %v851_v55 = vpack.c.bf16 %v632_v49, %v631_v48 }
 0x11f   :  { %208 = vmax.xlane.f32.xlu1 %v183_v51 }
 0x123   :  { %214 = vmax.xlane.f32.xlu1 %v186_v56 }
 0x127   :  { %218 = vmax.xlane.f32.xlu1 %v188_v58 }
 0x188   :  { %v191_v59 = vpop.xlane.xlu1 %190  ;;  %v195_v7 = vpop.xlane.xlu0 %194 }
 0x189   :  { %v245_v12 = vrot.slane %v195_v7, %v1053_v5  ;;  %v234_v13 = vrot.slane %v191_v59, %v1053_v5  ;;  %v633_v59 = vld [vmem:[%s1155_s6 + $0x10] sm:$0xff] }
 0x18c   :  { %v199_v60 = vpop.xlane.xlu1 %198  ;;  %v213_v27 = vpop.xlane.xlu0 %212 }
 0x18d   :  { %v343_v24 = vrot.slane %v199_v60, %v1053_v5  ;;  %v455_v38 = vrot.slane %v213_v27, %v1055_v6  ;;  %v634_v60 = vld [vmem:[%s1155_s6 + $0x18] sm:$0xff]  ;;  %s878_s6 = scalar_lea.vmem %s724_s11, 32 }
 0x18e   :  { %v854_v61 = vpack.c.bf16 %v634_v60, %v633_v59  ;;  %p879_p0 = scmp.ne.s32.totalorder %s724_s11, %s878_s6  ;;  %p884_p2 = scmp.lt.s32.totalorder %s878_s6, %s878_s6 }
 0x190   :  { %v203_v62 = vpop.xlane.xlu1 %202  ;;  %v217_v36 = vpop.xlane.xlu0 %216  ;;  %p885_p3 = por %p884_p2, %p883_p1 }
 0x191   :  { %v352_v25 = vrot.slane %v203_v62, %v1053_v5  ;;  %v545_v52 = vrot.slane %v217_v36, %v1055_v6  ;;  %v741_v62 = vld [vmem:[%s1154_s5] ss:$0 sm:$0xff] }
 0x192   :  { %p886_p4 = pnand %p885_p3, %p879_p0 }
 0x194   :  { %v207_v0 = vpop.xlane.xlu1 %206  ;;  %v221_v46 = vpop.xlane.xlu0 %220 }
 0x195   :  { %v442_v39 = vrot.slane %v207_v0, %v1053_v5  ;;  %v554_v53 = vrot.slane %v221_v46, %v1055_v6 }
 0x198   :  { %v193_v4 = vpop.xlane.xlu1 %192 }
 0x199   :  { %v239_v8 = vrot.slane %v193_v4, %v1055_v6 }
 0x19b   :  { %v241_v16 = vsel %vm240_vm1, %v239_v8, %v234_v13 }
 0x19c   :  { %v197_v11 = vpop.xlane.xlu1 %196 }
 0x19d   :  { %v249_v14 = vrot.slane %v197_v11, %v1055_v6 }
 0x19f   :  { %v250_v17 = vsel %vm240_vm1, %v249_v14, %v245_v12 }
 0x1a0   :  { %v201_v18 = vpop.xlane.xlu1 %200  ;;  %v252_v19 = vsel %vm251_vm2, %v250_v17, %v241_v16 }
 0x1a1   :  { %804 = vmatmul.mubr.msk.f32.vlgmr.msra.gmra.mrb[0].mxu1 %vm253_vm3, %v252_v19  ;;  %v347_v20 = vrot.slane %v201_v18, %v1055_v6 }
 0x1a2   :  { %843 = vmatpush3.bf16.msra.mxu1 %v842_v15  ;;  %810 = vmatprep.mubr.msk.f32.mxu1 %vm903_vm0, %v902_v1 }
 0x1a3   :  { %844 = vmatprep.subr.bf16.mxu1 %v905_v50  ;;  %v348_v29 = vsel %vm240_vm1, %v347_v20, %v343_v24 }
 0x1a4   :  { %v205_v23 = vpop.xlane.xlu1 %204 }
 0x1a5   :  { %v356_v26 = vrot.slane %v205_v23, %v1055_v6 }
 0x1a7   :  { %v357_v30 = vsel %vm240_vm1, %v356_v26, %v352_v25 }
 0x1a8   :  { %v211_v31 = vpop.xlane.xlu1 %210  ;;  %v358_v32 = vsel %vm251_vm2, %v357_v30, %v348_v29 }
 0x1a9   :  { %811 = vmatmul.mubr.msk.f32.vlgmr.msra.gmra.mrb[0].mxu1 %vm253_vm3, %v358_v32  ;;  %v451_v33 = vrot.slane %v211_v31, %v1053_v5 }
 0x1aa   :  { %846 = vmatpush3.bf16.msra.mxu1 %v845_v28  ;;  %817 = vmatprep.mubr.msk.f32.mxu1 %vm903_vm0, %v902_v1 }
 0x1ab   :  { %847 = vmatprep.subr.bf16.mxu1 %v905_v50  ;;  %v456_v42 = vsel %vm240_vm1, %v455_v38, %v451_v33 }
 0x1ac   :  { %v209_v37 = vpop.xlane.xlu1 %208 }
 0x1ad   :  { %v446_v40 = vrot.slane %v209_v37, %v1055_v6 }
 0x1af   :  { %v447_v43 = vsel %vm240_vm1, %v446_v40, %v442_v39 }
 0x1b0   :  { %v215_v44 = vpop.xlane.xlu1 %214  ;;  %v457_v45 = vsel %vm251_vm2, %v456_v42, %v447_v43 }
 0x1b1   :  { %818 = vmatmul.mubr.msk.f32.vlgmr.msra.gmra.mrb[0].mxu1 %vm253_vm3, %v457_v45  ;;  %v541_v47 = vrot.slane %v215_v44, %v1053_v5 }
 0x1b2   :  { %849 = vmatpush3.bf16.msra.mxu1 %v848_v41  ;;  %824 = vmatprep.mubr.msk.f32.mxu1 %vm903_vm0, %v902_v1 }
 0x1b3   :  { %850 = vmatprep.subr.bf16.mxu1 %v905_v50  ;;  %v546_v56 = vsel %vm240_vm1, %v545_v52, %v541_v47 }
 0x1b4   :  { %v219_v51 = vpop.xlane.xlu1 %218 }
 0x1b5   :  { %v550_v54 = vrot.slane %v219_v51, %v1053_v5 }
 0x1b7   :  { %v555_v57 = vsel %vm240_vm1, %v554_v53, %v550_v54 }
 0x1b8   :  { %v556_v58 = vsel %vm251_vm2, %v555_v57, %v546_v56 }
 0x1b9   :  { %825 = vmatmul.mubr.msk.f32.vlgmr.msra.gmra.mrb[0].mxu1 %vm253_vm3, %v556_v58 }
 0x1ba   :  { %852 = vmatpush3.bf16.msra.mxu1 %v851_v55  ;;  %835 = vmatprep.mubr.msk.f32.mxu1 %vm903_vm0, %v902_v1 }
 0x1bb   :  { %853 = vmatprep.subr.bf16.mxu1 %v905_v50  ;;  %v751_v50 = vld [vmem:[%s1156_s7] ss:$0 sm:$0xff] }
 0x1be   :  { %855 = vmatpush3.bf16.msra.mxu1 %v854_v61 }
 0x28c   :  { %v625_v63 = vpop.f32.mrb[0].mxu1 }
 0x28d   :  { %v856_v0 = vadd.f32 %v741_v62, %v625_v63  ;;  %v826_v2 = vpop.f32.mrb[1].mxu1 }
 0x28f   :  { %v630_v1 = vmax.f32 %v856_v0, 0.0 }
 0x291   :  { %836 = vmatmul.mubr.msk.f32.vlgmr.msra.gmra.mrb[2].mxu1 %vm642_vm4, %v630_v1 }
 0x364   :  { %v712_v3 = vpop.f32.mrb[2].mxu1 }
 0x365   :  { %v713_v4 = vadd.f32 %v751_v50, %v712_v3  ;;  %v837_v5 = vpop.f32.mrb[3].mxu1 }
 0x367   :  { %716 = vst [vmem:[#allocation2] sm:$0x3] %v713_v4 }
 0x368   :  { %889 = shalt.err (!%p886_p4)
}
 0x369   :  { %s890_s3 = scalar_lea.hbm %s1157_s8, 32 }
 0x36a   :  { %p891_p5 = scmp.ne.s32.totalorder %s1157_s8, %s890_s3  ;;  %p894_p6 = scmp.lt.u32.totalorder %s890_s3, %s1157_s8 }
 0x36c   :  { %p896_p7 = pnand %p894_p6, %p891_p5 }
 0x36e   :  { %899 = shalt.err (!%p896_p7)
}
 0x36f   :  { %726 = dma.vmem_to_hbm [thread:$0]  %s724_s11, 32, %s1157_s8, [#allocation3]  }
 0x370   :  { %900 = dma.done.wait [#allocation3], 32  }
 0x371   :  { %901 = vsyncadd [#allocation3], 4294967264 }
 0x372   :  { %730 = vsyncpa [#allocation3], 1 }

</bundles_post_ra>
